<compile_context>
chip_gen: v6e
topology: v6e:2x2x1
jax: 0.10.0
libtpu: 0.0.40
codegen_flags: <defaults>
</compile_context>

<pallas_src>
import jax
import jax.numpy as jnp
from jax.experimental import pallas as pl
from jax.experimental.pallas import tpu as pltpu


def _round_up(x, m):
    return (x + m - 1) // m * m


def gene_moduler_kernel(x_ref, w_ref, o_ref):
    # Hot path: (tm, I) @ (I, tn) MXU matmul in bf16 with f32 accumulation,
    # fused with ReLU.  The reference forward also calls LayerNorm(x) but
    # discards the result, so it is (faithfully) omitted here.
    acc = jnp.dot(x_ref[...], w_ref[...], preferred_element_type=jnp.float32)
    o_ref[...] = jnp.maximum(acc, 0.0).astype(o_ref.dtype)


def prepare_weights(weights, *, compute_dtype=jnp.bfloat16):
    """One-time weight re-layout (hoisted out of the per-call hot path).

    weights: (input_dim, hidden_dim, n_modules) f32.
    Returns w2d: (input_dim, N_pad) where column k*H + j holds W[:, j, k] and
    N_pad = round_up(n_modules*hidden_dim, 128) (zero-padded, lane-dense).
    """
    I, H, K = weights.shape
    N = K * H
    N_pad = _round_up(N, 128)
    w2d = jnp.transpose(weights, (0, 2, 1)).reshape(I, N)
    if N_pad != N:
        w2d = jnp.pad(w2d, ((0, 0), (0, N_pad - N)))
    # TODO(synk): optional fp8 (v7x) / int8 (v5e, v6e) weight path with a
    # per-column scale applied after the matmul for another ~2x on weight BW.
    return w2d.astype(compute_dtype)


def _vmem_budget():
    """Generation-aware VMEM budget (~3/4 of physical VMEM) and capacity."""
    cap = 64 * 1024 * 1024  # conservative (v7x-sized) fallback
    try:
        cap = int(pltpu.get_tpu_info().vmem_capacity_bytes)
    except Exception:
        pass
    return (cap * 3) // 4, cap


def gene_moduler_forward(x, w2d, hidden_dim, n_modules,
                         *, out_dtype=jnp.float32, vmem_budget_bytes=None):
    """x: (B, input_dim); w2d: output of prepare_weights.

    Returns (B, n_modules, hidden_dim) out_dtype
      == relu(einsum('bi,ijk->bjk', x, W).transpose(2, 1))
    """
    B, I = x.shape
    I2, N_pad = w2d.shape
    assert I == I2 and N_pad % 128 == 0
    N = n_modules * hidden_dim
    assert N_pad == _round_up(N, 128)

    # Hoisted activation cast: match the (bf16) weight compute dtype so the
    # kernel streams half the x bytes and does no per-tile VPU convert.
    if x.dtype != w2d.dtype:
        x = x.astype(w2d.dtype)

    auto_budget, vmem_cap = _vmem_budget()
    budget = int(vmem_budget_bytes) if vmem_budget_bytes is not None else auto_budget

    x_bytes = jnp.dtype(x.dtype).itemsize
    w_bytes = jnp.dtype(w2d.dtype).itemsize
    o_bytes = jnp.dtype(out_dtype).itemsize

    def vmem_need(tm, tn):
        # Double-buffered input + output tiles (conservative estimate).
        return 2 * (tm * I * x_bytes + I * tn * w_bytes + tm * tn * o_bytes)

    # Larger batch tile = fewer weight re-streams on a weight-BW-bound kernel.
    tm = min(_round_up(B, 8), 512)
    # Column tile: multiple of 128, shrunk until the tiles fit the budget.
    tn = min(N_pad, 2048)
    while tn > 128 and vmem_need(tm, tn) > budget:
        tn -= 128
    # Fallback for very large input_dim: shrink the batch tile.
    while tm > 8 and vmem_need(tm, tn) > budget:
        tm = max(8, _round_up(tm // 2, 8))
    # TODO(synk): if vmem_need still exceeds budget (huge input_dim), add an
    # I-reduction grid axis with an f32 VMEM accumulator instead.

    vmem_limit = min(max(vmem_need(tm, tn) + 4 * 1024 * 1024, 32 * 1024 * 1024),
                     vmem_cap)

    nb = pl.cdiv(B, tm)       # batch tiles
    nn = pl.cdiv(N_pad, tn)   # output-column (K*H) tiles

    # Grid order by total HBM traffic:
    #   activation-stationary re-streams W once per batch tile,
    #   weight-stationary re-streams x once per column tile.
    w_total = I * N_pad * w_bytes
    x_total = B * I * x_bytes
    cost_act_stationary = x_total + nb * w_total
    cost_wgt_stationary = w_total + nn * x_total
    weight_stationary = (nb > 1) and (cost_wgt_stationary < cost_act_stationary)

    if weight_stationary:
        grid = (nn, nb)  # inner axis = batch -> weight block constant inner
        x_spec = pl.BlockSpec((tm, I), lambda n, i: (i, 0))
        w_spec = pl.BlockSpec((I, tn), lambda n, i: (0, n))
        o_spec = pl.BlockSpec((tm, tn), lambda n, i: (i, n))
    else:
        grid = (nb, nn)  # inner axis = columns -> x block constant inner
        x_spec = pl.BlockSpec((tm, I), lambda i, n: (i, 0))
        w_spec = pl.BlockSpec((I, tn), lambda i, n: (0, n))
        o_spec = pl.BlockSpec((tm, tn), lambda i, n: (i, n))

    out = pl.pallas_call(
        gene_moduler_kernel,
        out_shape=jax.ShapeDtypeStruct((B, N_pad), out_dtype),
        grid_spec=pltpu.PrefetchScalarGridSpec(
            num_scalar_prefetch=0,
            grid=grid,
            in_specs=[x_spec, w_spec],
            out_specs=o_spec,
        ),
        compiler_params=pltpu.CompilerParams(
            # No reduction axis: both grid axes are independent, so both are
            # "parallel" (lets v7x shard across both TensorCores even when
            # there is only a single batch tile).
            dimension_semantics=("parallel", "parallel"),
            vmem_limit_bytes=int(vmem_limit),
        ),
    )(x, w2d)

    if N_pad != N:
        out = out[:, :N]  # drop lane padding (skipped when K*H is 128-aligned)
    return out.reshape(B, n_modules, hidden_dim)


def init_params(key, input_dim, hidden_dim, n_modules):
    """Deterministic parameter init mirroring the module's __init__ shapes."""
    k_w, _ = jax.random.split(key)
    # xavier_normal_ on an (I, H, K) tensor: fan_in = H*K, fan_out = I*K
    fan_in = hidden_dim * n_modules
    fan_out = input_dim * n_modules
    std = (2.0 / (fan_in + fan_out)) ** 0.5
    weights = std * jax.random.normal(
        k_w, (input_dim, hidden_dim, n_modules), dtype=jnp.float32
    )
    # LayerNorm params exist in the module but its output is unused in forward.
    ln_gamma = jnp.ones((input_dim,), jnp.float32)
    ln_beta = jnp.zeros((input_dim,), jnp.float32)
    return weights, ln_gamma, ln_beta


if __name__ == "__main__":
    # Small shapes consistent with the module (defaults scaled down):
    B, INPUT_DIM, HIDDEN_DIM, N_MODULES = 8, 256, 8, 16

    key = jax.random.PRNGKey(0)
    k_x, k_p = jax.random.split(key)
    x = jax.random.normal(k_x, (B, INPUT_DIM), dtype=jnp.float32)
    weights, ln_gamma, ln_beta = init_params(k_p, INPUT_DIM, HIDDEN_DIM, N_MODULES)

    # One-time weight re-layout (would be cached alongside params in practice).
    w2d = prepare_weights(weights)

    out = gene_moduler_forward(x, w2d, HIDDEN_DIM, N_MODULES)
    out = jax.block_until_ready(out)

    # Pure-JAX reference of the PyTorch forward (f32).
    ref = jnp.einsum("bi,ijk->bjk", x, weights)          # (B, H, K)
    ref = jnp.maximum(jnp.transpose(ref, (0, 2, 1)), 0)  # (B, K, H)
    assert out.shape == (B, N_MODULES, HIDDEN_DIM)
    # bf16 inputs + f32 accumulation -> small rounding difference vs f32 ref.
    assert jnp.allclose(out, ref, atol=3e-2, rtol=3e-2), "mismatch vs reference"

    print("KERNEL_OK")
</pallas_src>

<mosaic_0001>
module attributes {stable_mosaic.version = 11 : i64} {
  func.func @gene_moduler_kernel(%arg0: i32, %arg1: i32, %arg2: memref<8x256xbf16, #tpu.memory_space<vmem>>, %arg3: memref<256x128xbf16, #tpu.memory_space<vmem>>, %arg4: memref<8x128xf32, #tpu.memory_space<vmem>>) attributes {dimension_semantics = [#tpu.dimension_semantics<parallel>, #tpu.dimension_semantics<parallel>], iteration_bounds = array<i64: 1, 1>, scalar_prefetch = 0 : i64, scratch_operands = 0 : i64, tpu.core_type = #tpu.core_type<tc>, window_params = [{transform_indices = @transform_0, window_bounds = array<i64: 8, 256>}, {transform_indices = @transform_1, window_bounds = array<i64: 256, 128>}, {transform_indices = @transform_2, window_bounds = array<i64: 8, 128>}]} {
    %c0 = arith.constant 0 : index
    %c0_0 = arith.constant 0 : index
    %0 = vector.load %arg2[%c0, %c0_0] : memref<8x256xbf16, #tpu.memory_space<vmem>>, vector<8x256xbf16>
    %c0_1 = arith.constant 0 : index
    %c0_2 = arith.constant 0 : index
    %1 = vector.load %arg3[%c0_1, %c0_2] : memref<256x128xbf16, #tpu.memory_space<vmem>>, vector<256x128xbf16>
    %cst = arith.constant dense<0.000000e+00> : vector<8x128xf32>
    %2 = tpu.matmul %0, %1, %cst {dimension_numbers = #tpu.dot_dimension_numbers<[1], [0], [0], [1], [0, 0, 1, 1], [], []>} : vector<8x256xbf16>, vector<256x128xbf16>, vector<8x128xf32> -> vector<8x128xf32>
    %cst_3 = arith.constant 0.000000e+00 : f32
    %3 = vector.broadcast %cst_3 : f32 to vector<8x128xf32>
    %4 = arith.maximumf %2, %3 : vector<8x128xf32>
    %c0_4 = arith.constant 0 : index
    %c0_5 = arith.constant 0 : index
    %5 = vector.load %arg4[%c0_4, %c0_5] : memref<8x128xf32, #tpu.memory_space<vmem>>, vector<8x128xf32>
    tpu.vector_store %arg4[%c0_4, %c0_5], %4 {strides = array<i32>} : memref<8x128xf32, #tpu.memory_space<vmem>>, vector<8x128xf32>,
    return
  }
  func.func @transform_0(%arg0: i32, %arg1: i32) -> (i32, i32) {
    %c0_i32 = arith.constant 0 : i32
    %c0_i32_0 = arith.constant 0 : i32
    return %arg0, %c0_i32 : i32, i32
  }
  func.func @transform_1(%arg0: i32, %arg1: i32) -> (i32, i32) {
    %c0_i32 = arith.constant 0 : i32
    %c0_i32_0 = arith.constant 0 : i32
    return %c0_i32, %arg1 : i32, i32
  }
  func.func @transform_2(%arg0: i32, %arg1: i32) -> (i32, i32) {
    %c0_i32 = arith.constant 0 : i32
    return %arg0, %arg1 : i32, i32
  }
}

</mosaic_0001>

<bundles_post_ra>
// kernel: tpu_custom_call.1
= control target key start
LH: loop header
LB: loop body
LE: loop exit
PB: predicated region body
PF: predicated region fallthrough
CT: control target
= control target key end

     0   :  { %7 = vsyncpa [#allocation3], 0  ;;  %s391_s0 = inlined_call_operand.hbm [shape: bf16[8,256], index: 0, kind: input, shape index: {}]   ;;  %s392_s1 = inlined_call_operand.hbm [shape: bf16[256,128], index: 1, kind: input, shape index: {}]   ;;  %s393_s2 = inlined_call_operand.hbm [shape: f32[8,128], index: 2, kind: output, shape index: {}]  }
   0x1   :  { %8 = vsyncpa [#allocation6], 0 }
   0x2   :  { %9 = vsyncpa [#allocation4], 0  ;;  %s362_s9 = smov [#allocation2]   ;;  %s363_s11 = smov [#allocation5]  }
   0x3   :  { %s16_s10 = sshll.u32 %s362_s9, 4  ;;  %s25_s12 = sshll.u32 %s363_s11, 4  ;;  %s17_s10 = int_to_ptr.vmem [resolvable:$true] %s16_s10  ;;  %s26_s12 = int_to_ptr.vmem [resolvable:$true] %s25_s12 }
   0x4   :  { %s304_s13 = scalar_lea.vmem %s17_s10, 128  ;;  %p309_p1 = scmp.lt.s32.totalorder %s17_s10, %s17_s10 }
   0x5   :  { %p305_p0 = scmp.ne.s32.totalorder %s17_s10, %s304_s13  ;;  %p310_p2 = scmp.lt.s32.totalorder %s304_s13, %s304_s13 }
   0x7   :  { %p311_p3 = por %p310_p2, %p309_p1 }
   0x9   :  { %p312_p4 = pnand %p311_p3, %p305_p0 }
   0xb   :  { %315 = shalt.err (!%p312_p4)
}
   0xc   :  { %19 = dma.hbm_to_vmem [thread:$0]  %s391_s0, 128, %s17_s10, [#allocation3]  }
   0xd   :  { %s324_s16 = scalar_lea.vmem %s26_s12, 2048  ;;  %p329_p6 = scmp.lt.s32.totalorder %s26_s12, %s26_s12 }
   0xe   :  { %p325_p5 = scmp.ne.s32.totalorder %s26_s12, %s324_s16  ;;  %p330_p7 = scmp.lt.s32.totalorder %s324_s16, %s324_s16 }
  0x10   :  { %p331_p8 = por %p330_p7, %p329_p6 }
  0x12   :  { %p332_p9 = pnand %p331_p8, %p325_p5 }
  0x14   :  { %335 = shalt.err (!%p332_p9)
}
  0x15   :  { %s364_s17 = smov 64   ;;  %s365_s18 = smov 4  }
  0x16   :  { %31 = dma.hbm_to_vmem [thread:$0]  %s392_s1, 2048, %s26_s12, [#allocation6], %s364_s17, %s364_s17, %s365_s18  }
  0x17   :  { %356 = dma.done.wait [#allocation3], 128  }
  0x18   :  { %357 = vsyncadd [#allocation3], 4294967168 }
  0x19   :  { %358 = dma.done.wait [#allocation6], 2048  }
  0x1a   :  { %359 = vsyncadd [#allocation6], 4294965248  ;;  %v278_v0 = vld [vmem:[#allocation5 + $0x78] sm:$0xff]   ;;  %v280_v2 = vld [vmem:[#allocation5 + $0x70] sm:$0xff]   ;;  %s366_s0 = smov [#allocation7]  }
  0x1b   :  { %v279_v1 = vld [vmem:[#allocation5 + $0x38] sm:$0xff]   ;;  %251 = vmatprep.subr.bf16.mxu0 %v278_v0  ;;  %v281_v3 = vld [vmem:[#allocation5 + $0x30] sm:$0xff]   ;;  %v282_v4 = vld [vmem:[#allocation5 + $0x68] sm:$0xff]   ;;  %s223_s1 = sshll.u32 %s366_s0, 4  ;;  %s224_s1 = int_to_ptr.vmem [resolvable:$true] %s223_s1 }
  0x1c   :  { %252 = vmatpush3.bf16.msra.mxu0 %v279_v1  ;;  %v283_v5 = vld [vmem:[#allocation5 + $0x28] sm:$0xff]   ;;  %v284_v6 = vld [vmem:[#allocation5 + $0x60] sm:$0xff]   ;;  %v286_v8 = vld [vmem:[#allocation5 + $0x58] sm:$0xff]   ;;  %s336_s21 = scalar_lea.vmem %s224_s1, 128  ;;  %p341_p11 = scmp.lt.s32.totalorder %s224_s1, %s224_s1 }
  0x1d   :  { %253 = vmatprep.subr.bf16.mxu0 %v280_v2  ;;  %v285_v7 = vld [vmem:[#allocation5 + $0x20] sm:$0xff]   ;;  %v287_v9 = vld [vmem:[#allocation5 + $0x18] sm:$0xff]   ;;  %v288_v10 = vld [vmem:[#allocation5 + $0x50] sm:$0xff]   ;;  %p337_p10 = scmp.ne.s32.totalorder %s224_s1, %s336_s21  ;;  %p342_p12 = scmp.lt.s32.totalorder %s336_s21, %s336_s21 }
  0x1e   :  { %v39_v11 = vld [vmem:[#allocation2] sm:$0xff]  ;;  %v289_v13 = vld [vmem:[#allocation5 + $0x10] sm:$0xff]   ;;  %v290_v14 = vld [vmem:[#allocation5 + $0x48] sm:$0xff]  }
  0x1f   :  { %v234_v12 = vcombine.high %v39_v11, %v39_v11  ;;  %v291_v15 = vld [vmem:[#allocation5 + $0x8] sm:$0xff]   ;;  %v292_v16 = vld [vmem:[#allocation5 + $0x40] sm:$0xff]   ;;  %v233_v18 = vcombine.low %v39_v11, %v39_v11  ;;  %p343_p13 = por %p342_p12, %p341_p11 }
  0x20   :  { %254 = vmatpush3.bf16.msra.mxu0 %v281_v3  ;;  %v293_v17 = vld [vmem:[#allocation5] sm:$0xff]  }
  0x21   :  { %255 = vmatprep.subr.bf16.mxu0 %v282_v4  ;;  %207 = vmatprep.mubr.bf16.mxu0 %v234_v12  ;;  %p344_p0 = pnand %p343_p13, %p337_p10 }
  0x24   :  { %256 = vmatpush3.bf16.msra.mxu0 %v283_v5 }
  0x25   :  { %257 = vmatprep.subr.bf16.mxu0 %v284_v6 }
  0x28   :  { %258 = vmatpush3.bf16.msra.mxu0 %v285_v7 }
  0x29   :  { %259 = vmatprep.subr.bf16.mxu0 %v286_v8 }
  0x2c   :  { %260 = vmatpush3.bf16.msra.mxu0 %v287_v9 }
  0x2d   :  { %261 = vmatprep.subr.bf16.mxu0 %v288_v10 }
  0x30   :  { %262 = vmatpush3.bf16.msra.mxu0 %v289_v13 }
  0x31   :  { %263 = vmatprep.subr.bf16.mxu0 %v290_v14 }
  0x34   :  { %264 = vmatpush3.bf16.msra.mxu0 %v291_v15 }
  0x35   :  { %265 = vmatprep.subr.bf16.mxu0 %v292_v16 }
  0x38   :  { %266 = vmatpush3.bf16.msra.mxu0 %v293_v17 }
  0x3b   :  { %208 = vmatmul.mubr.bf16.vlgmr.msra.gmra.mxu0 %v233_v18 }
  0xfb   :  { %v267_v19 = vpop.f32.mrf.mxu0 }
  0xfd   :  { %v268_v20 = vpop.f32.mrf.mxu0 }
  0xfe   :  { %v269_v21 = vadd.f32 %v268_v20, %v267_v19 }
  0xff   :  { %v270_v22 = vpop.f32.mrf.mxu0 }
 0x100   :  { %v215_v23 = vmax.f32 %v269_v21, 0.0 }
 0x101   :  { %v271_v24 = vpop.f32.mrf.mxu0 }
 0x102   :  { %216 = vst [vmem:[#allocation7] sm:$0xff] %v215_v23 }
 0x103   :  { %347 = shalt.err (!%p344_p0)
}
 0x104   :  { %226 = dma.vmem_to_hbm [thread:$0]  %s224_s1, 128, %s393_s2, [#allocation4]  }
 0x105   :  { %360 = dma.done.wait [#allocation4], 128  }
 0x106   :  { %361 = vsyncadd [#allocation4], 4294967168 }
 0x107   :  { %230 = vsyncpa [#allocation3], 1 }
 0x108   :  { %231 = vsyncpa [#allocation6], 1 }
 0x109   :  { %232 = vsyncpa [#allocation4], 1 }

</bundles_post_ra>
